<compile_context>
chip_gen: v5e
topology: v5e:2x2
jax: 0.10.0
libtpu: 0.0.40
codegen_flags: <defaults>
</compile_context>

<pallas_src>
import jax
import jax.numpy as jnp
from jax.experimental import pallas as pl
from jax.experimental.pallas import tpu as pltpu


def _round_up(v, m):
    return (v + m - 1) // m * m


def _conv1x1_mxu_kernel(w_ref, x_ref, o_ref):
    # w_ref: (C_out, C_in), x_ref: (C_in, TM), o_ref: (C_out, TM)
    o_ref[...] = jnp.dot(
        w_ref[...], x_ref[...], preferred_element_type=jnp.float32
    ).astype(o_ref.dtype)


def _conv1x1_vpu_kernel(w_ref, x_ref, o_ref):
    # Tiny-channel path (C_in <= 8): the contraction is far too small to feed
    # the MXU, so do a VALU broadcast multiply-accumulate over the lane-dense
    # (C_out, TM) tile instead.  Unrolled static Python loop over C_in.
    c_out, c_in = w_ref.shape
    w = w_ref[...].astype(jnp.float32)          # (C_out, C_in)
    x = x_ref[...].astype(jnp.float32)          # (C_in, TM)
    acc = w[:, 0:1] * x[0:1, :]                 # (C_out,1)*(1,TM) -> (C_out,TM)
    for ci in range(1, c_in):
        acc = acc + w[:, ci:ci + 1] * x[ci:ci + 1, :]
    o_ref[...] = acc.astype(o_ref.dtype)


def downsample_c(x, weight, stride):
    """1x1 conv, stride `stride`, padding 0, no bias (DownsampleC.forward).

    x:      (N, C_in, H, W)     NCHW (PyTorch convention)
    weight: (C_out, C_in, 1, 1) PyTorch Conv2d weight
    returns (N, C_out, Ho, Wo)  with Ho = floor((H-1)/stride)+1, same for W.
    """
    n, c_in, h, w = x.shape
    c_out = weight.shape[0]

    # Strided spatial subsample (XLA glue).
    # TODO(synk): fuse the stride into the kernel (strided pl.ds load from the
    # raw NCHW block) to remove this extra HBM read+write pass.
    xs = x[:, :, ::stride, ::stride]                       # (N, C_in, Ho, Wo)
    ho, wo = xs.shape[2], xs.shape[3]
    m = ho * wo

    # Native-NCHW matmul operands: W(C_out, C_in) @ X(C_in, M) per batch.
    x_mat = xs.reshape(n, c_in, m)                         # contiguous, free
    w_mat = weight.reshape(c_out, c_in)

    # Tile the pixel (lane) dim; pad the ragged tail so every block is exact
    # (no runtime OOB checks on VMEM refs).
    tm = min(512, _round_up(m, 128))
    m_pad = _round_up(m, tm)
    if m_pad != m:
        x_mat = jnp.pad(x_mat, ((0, 0), (0, 0), (0, m_pad - m)))

    grid = (n, m_pad // tm)

    kernel = _conv1x1_vpu_kernel if c_in <= 8 else _conv1x1_mxu_kernel

    # VMEM budget: double-buffered X and OUT tiles (+ weight + headroom),
    # clamped to stay well under v7x's 64 MiB physical VMEM.
    dt_bytes = x.dtype.itemsize
    blk_bytes = dt_bytes * tm * (_round_up(c_in, 8) + _round_up(c_out, 8))
    vmem_limit = int(min(max(4 * blk_bytes + (2 << 20), 8 << 20), 48 << 20))

    cost = pl.CostEstimate(
        flops=2 * n * m * c_in * c_out,
        transcendentals=0,
        bytes_accessed=dt_bytes * (n * m * c_in + n * m * c_out + c_in * c_out),
    )

    out_mat = pl.pallas_call(
        kernel,
        out_shape=jax.ShapeDtypeStruct((n, c_out, m_pad), x.dtype),
        grid=grid,
        in_specs=[
            # Weight: one small block, stays VMEM-resident across the grid.
            pl.BlockSpec((c_out, c_in), lambda b, i: (0, 0)),
            # X tile: (C_in, TM) for batch b, pixel tile i.
            pl.BlockSpec((None, c_in, tm), lambda b, i: (b, 0, i)),
        ],
        out_specs=pl.BlockSpec((None, c_out, tm), lambda b, i: (b, 0, i)),
        compiler_params=pltpu.CompilerParams(
            dimension_semantics=("parallel", "parallel"),
            vmem_limit_bytes=vmem_limit,
        ),
        cost_estimate=cost,
    )(w_mat, x_mat)

    out_mat = out_mat[:, :, :m] if m_pad != m else out_mat
    return out_mat.reshape(n, c_out, ho, wo)


def _reference(x, weight, stride):
    return jax.lax.conv_general_dilated(
        x, weight, window_strides=(stride, stride), padding="VALID",
        dimension_numbers=("NCHW", "OIHW", "NCHW"),
    )


if __name__ == "__main__":
    key = jax.random.PRNGKey(0)
    k_x, k_w, k_x2, k_w2 = jax.random.split(key, 4)

    # Module config: n_in=4, n_out=8, stride=2 (stride != 1 satisfies assert).
    n_in, n_out, stride = 4, 8, 2
    N, H, W = 2, 16, 16
    x = jax.random.normal(k_x, (N, n_in, H, W), dtype=jnp.float32)
    weight = jax.random.normal(k_w, (n_out, n_in, 1, 1), dtype=jnp.float32) * 0.1

    out = downsample_c(x, weight, stride)
    out = jax.block_until_ready(out)
    ref = _reference(x, weight, stride)
    assert out.shape == ref.shape == (N, n_out, H // stride, W // stride)
    assert jnp.allclose(out, ref, atol=1e-5, rtol=1e-5)

    # Second config: exercises the MXU path, multi-tile M grid and the ragged
    # tail padding (Ho*Wo = 576 -> padded to 1024 with TM=512).
    n_in2, n_out2, stride2 = 16, 32, 2
    N2, H2, W2 = 2, 48, 48
    x2 = jax.random.normal(k_x2, (N2, n_in2, H2, W2), dtype=jnp.float32)
    w2 = jax.random.normal(k_w2, (n_out2, n_in2, 1, 1), dtype=jnp.float32) * 0.1

    out2 = downsample_c(x2, w2, stride2)
    out2 = jax.block_until_ready(out2)
    ref2 = _reference(x2, w2, stride2)
    assert out2.shape == ref2.shape
    assert jnp.allclose(out2, ref2, atol=1e-4, rtol=1e-4)

    print("KERNEL_OK")
</pallas_src>

<mosaic_0001>
module attributes {stable_mosaic.version = 11 : i64} {
  func.func @_conv1x1_vpu_kernel(%arg0: i32, %arg1: i32, %arg2: memref<8x4xf32, #tpu.memory_space<vmem>>, %arg3: memref<1x4x128xf32, #tpu.memory_space<vmem>>, %arg4: memref<1x8x128xf32, #tpu.memory_space<vmem>>) attributes {dimension_semantics = [#tpu.dimension_semantics<parallel>, #tpu.dimension_semantics<parallel>], iteration_bounds = array<i64: 2, 1>, scalar_prefetch = 0 : i64, scratch_operands = 0 : i64, tpu.core_type = #tpu.core_type<tc>, window_params = [{pipeline_mode = #tpu.pipeline_mode<synchronous>, transform_indices = @transform_0, window_bounds = array<i64: 8, 4>}, {transform_indices = @transform_1, window_bounds = array<i64: 1, 4, 128>}, {transform_indices = @transform_2, window_bounds = array<i64: 1, 8, 128>}]} {
    %c0 = arith.constant 0 : index
    %c0_0 = arith.constant 0 : index
    %0 = vector.load %arg2[%c0, %c0_0] : memref<8x4xf32, #tpu.memory_space<vmem>>, vector<8x4xf32>
    %c0_1 = arith.constant 0 : index
    %c0_2 = arith.constant 0 : index
    %c0_3 = arith.constant 0 : index
    %1 = vector.load %arg3[%c0_1, %c0_2, %c0_3] : memref<1x4x128xf32, #tpu.memory_space<vmem>>, vector<1x4x128xf32>
    %2 = vector.shape_cast %1 : vector<1x4x128xf32> to vector<4x128xf32>
    %3 = vector.extract_strided_slice %0 {offsets = [0, 0], sizes = [8, 1], strides = [1, 1]} : vector<8x4xf32> to vector<8x1xf32>
    %4 = vector.extract_strided_slice %2 {offsets = [0, 0], sizes = [1, 128], strides = [1, 1]} : vector<4x128xf32> to vector<1x128xf32>
    %5 = vector.broadcast %3 : vector<8x1xf32> to vector<8x128xf32>
    %6 = vector.broadcast %4 : vector<1x128xf32> to vector<8x128xf32>
    %7 = arith.mulf %5, %6 : vector<8x128xf32>
    %8 = vector.extract_strided_slice %0 {offsets = [0, 1], sizes = [8, 1], strides = [1, 1]} : vector<8x4xf32> to vector<8x1xf32>
    %9 = vector.extract_strided_slice %2 {offsets = [1, 0], sizes = [1, 128], strides = [1, 1]} : vector<4x128xf32> to vector<1x128xf32>
    %10 = vector.broadcast %8 : vector<8x1xf32> to vector<8x128xf32>
    %11 = vector.broadcast %9 : vector<1x128xf32> to vector<8x128xf32>
    %12 = arith.mulf %10, %11 : vector<8x128xf32>
    %13 = arith.addf %7, %12 : vector<8x128xf32>
    %14 = vector.extract_strided_slice %0 {offsets = [0, 2], sizes = [8, 1], strides = [1, 1]} : vector<8x4xf32> to vector<8x1xf32>
    %15 = vector.extract_strided_slice %2 {offsets = [2, 0], sizes = [1, 128], strides = [1, 1]} : vector<4x128xf32> to vector<1x128xf32>
    %16 = vector.broadcast %14 : vector<8x1xf32> to vector<8x128xf32>
    %17 = vector.broadcast %15 : vector<1x128xf32> to vector<8x128xf32>
    %18 = arith.mulf %16, %17 : vector<8x128xf32>
    %19 = arith.addf %13, %18 : vector<8x128xf32>
    %20 = vector.extract_strided_slice %0 {offsets = [0, 3], sizes = [8, 1], strides = [1, 1]} : vector<8x4xf32> to vector<8x1xf32>
    %21 = vector.extract_strided_slice %2 {offsets = [3, 0], sizes = [1, 128], strides = [1, 1]} : vector<4x128xf32> to vector<1x128xf32>
    %22 = vector.broadcast %20 : vector<8x1xf32> to vector<8x128xf32>
    %23 = vector.broadcast %21 : vector<1x128xf32> to vector<8x128xf32>
    %24 = arith.mulf %22, %23 : vector<8x128xf32>
    %25 = arith.addf %19, %24 : vector<8x128xf32>
    %c0_4 = arith.constant 0 : index
    %c0_5 = arith.constant 0 : index
    %c0_6 = arith.constant 0 : index
    %26 = vector.load %arg4[%c0_4, %c0_5, %c0_6] : memref<1x8x128xf32, #tpu.memory_space<vmem>>, vector<1x8x128xf32>
    %27 = vector.shape_cast %26 : vector<1x8x128xf32> to vector<8x128xf32>
    %28 = vector.shape_cast %25 : vector<8x128xf32> to vector<1x8x128xf32>
    tpu.vector_store %arg4[%c0_4, %c0_5, %c0_6], %28 {strides = array<i32>} : memref<1x8x128xf32, #tpu.memory_space<vmem>>, vector<1x8x128xf32>,
    return
  }
  func.func @transform_0(%arg0: i32, %arg1: i32) -> (i32, i32) {
    %c0_i32 = arith.constant 0 : i32
    %c0_i32_0 = arith.constant 0 : i32
    %c0_i32_1 = arith.constant 0 : i32
    return %c0_i32, %c0_i32_0 : i32, i32
  }
  func.func @transform_1(%arg0: i32, %arg1: i32) -> (i32, i32, i32) {
    %c0_i32 = arith.constant 0 : i32
    %c0_i32_0 = arith.constant 0 : i32
    return %arg0, %c0_i32, %arg1 : i32, i32, i32
  }
  func.func @transform_2(%arg0: i32, %arg1: i32) -> (i32, i32, i32) {
    %c0_i32 = arith.constant 0 : i32
    %c0_i32_0 = arith.constant 0 : i32
    return %arg0, %c0_i32, %arg1 : i32, i32, i32
  }
}

</mosaic_0001>

<bundles_post_ra>
// kernel: tpu_custom_call.1
= control target key start
LH: loop header
LB: loop body
LE: loop exit
PB: predicated region body
PF: predicated region fallthrough
CT: control target
= control target key end

     0   :  { %7 = vsyncpa [#allocation3], 0  ;;  %s557_s0 = inlined_call_operand.vmem [shape: f32[8,4], index: 0, kind: input, shape index: {}]   ;;  %s558_s1 = inlined_call_operand.vmem [shape: f32[2,4,128], index: 1, kind: input, shape index: {}]   ;;  %s559_s2 = inlined_call_operand.hbm [shape: f32[2,8,128], index: 2, kind: output, shape index: {}]  }
   0x1   :  { %9 = vsyncpa [#allocation3 + $0x1], 0  ;;  %s457_s9 = smov 0   ;;  %s459_s10 = smov 0  }
   0x2   :  { %s461_s11 = smov 0   ;;  %s463_s12 = smov 0  }
   0x3   :  { %s465_s13 = smov 0   ;;  %s467_s14 = smov 0  }
   0x4 LB: > { %s283_s15 = sadd.s32 4294967295, %s436_s14   ;;  %s284_s16 = sadd.s32 4294967294, %s436_s14   ;;  %s436_s14 = sphi %s467_s14, %s15_s14   ;;  %s432_s13 = sphi %s465_s13, %s566_s13   ;;  %s428_s12 = sphi %s463_s12, %s565_s12   ;;  %s424_s11 = sphi %s461_s11, %s564_s11   ;;  %s420_s10 = sphi %s459_s10, %s563_s10   ;;  %s416_s9 = sphi %s457_s9, %s562_s9  }
   0x5   : > { %s27_s17 = sadd.s32 1, %s432_s13  ;;  %s85_s18 = sadd.s32 1, %s424_s11 }
   0x6   : > { %p29_p0 = scmp.ge.s32.totalorder %s27_s17, 2  ;;  %p95_p1 = scmp.ne.s32.totalorder %s424_s11, %s420_s10 }
   0x7   : > { %p96_p2 = scmp.eq.s32.totalorder %s283_s15, 1  ;;  %p101_p3 = scmp.ne.s32.totalorder %s420_s10, %s416_s9 }
   0x8   : > { %s568_s17 = smov (%p29_p0, %s27_s17), 0  ;;  %p102_p5 = scmp.eq.s32.totalorder %s284_s16, 1 }
   0x9   : > { %p497_p4 = por %p96_p2, %p95_p1  ;;  %s80_s20 = ssub.s32 %s432_s13, %s568_s17 }
   0xa   : > { %p287_p6 = scmp.ge.s32.totalorder %s436_s14, 1  ;;  %p83_p7 = scmp.eq.s32.totalorder %s80_s20, 0 }
   0xb   : > { %p504_p8 = por %p102_p5, %p101_p3  ;;  %p133_p9 = scmp.lt.s32.totalorder %s436_s14, 3 }
   0xc   : > { %s510_s22 = scalar_select %p83_p7, %s424_s11, %s85_s18  }
   0xd   : > { %p134_p10 = pnand %p287_p6, %p133_p9 }
   0xe   : > { %p157_p11 = scmp.lt.s32.totalorder (!%p134_p10), %s428_s12, 1  ;;  %s154_s30 = sand.u32 (!%p134_p10), 1, %s420_s10  }
   0xf   : > { %137 = sbr.rel (%p134_p10) target bundleno = 157 (0x9d), region = 28  ;;  %s288_s3 = sshll.u32 (!%p134_p10), %s154_s30, 3 }
  0x10   : > { %s291_s4 = sshll.u32 (!%p134_p10), %s428_s12, 3  ;;  %s156_s8 = scalar_lea.vmem (!%p134_p10), [#allocation2], %s288_s3 }
  0x11   : > { %s207_s7 = scalar_lea.hbm (!%p134_p10), %s559_s2, %s291_s4  ;;  %s209_s15 = sshll.u32 (!%p134_p10), %s156_s8, 4  ;;  %s210_s15 = int_to_ptr.vmem [resolvable:$true] %s209_s15 }
  0x12   : > { %s211_s16 = sshll.u32 (!%p134_p10), %s207_s7, 4  ;;  %s212_s16 = int_to_ptr.hbm [resolvable:$true] %s211_s16 }
  0x13   : > { %s372_s18 = sshra.s32 (!%p134_p10), %s212_s16, 4  ;;  %s373_s18 = int_to_ptr.hbm [resolvable:$true] %s372_s18 }
  0x14   : > { %v164_v0 = vld [vmem:[%s557_s0] sm:$0xff]  ;;  %v438_v1 = vmov 0   ;;  %v439_v2 = vmov 2   ;;  %v440_v3 = vmov 1   ;;  %v441_v4 = vmov 3   ;;  %s158_s25 = scalar_select %p157_p11, %s428_s12, 1 }
  0x15   : > { %353 = vset.pattern.permute.xlu0 %v438_v1  ;;  %355 = vset.pattern.permute.xlu1 %v439_v2  ;;  %s196_s12 = scalar_lea.sflag [#allocation3], %s154_s30  ;;  %s374_s20 = scalar_lea.hbm %s373_s18, 8 }
  0x16   : > { %168 = vperm.xlu0 %353, %v164_v0   ;;  %181 = vperm.xlu1 %355, %v164_v0   ;;  %s289_s26 = sshll.u32 %s158_s25, 2  ;;  %p375_p12 = scmp.ne.s32.totalorder %s373_s18, %s374_s20 }
  0x17   : > { %s163_s29 = scalar_lea.vmem %s558_s1, %s289_s26  ;;  %s378_s25 = scalar_lea.hbm %s559_s2, 16 }
  0x18   : > { %v165_v7 = vld [vmem:[%s163_s29] sm:$0xf]  ;;  %p376_p13 = pnand %p375_p12, %p497_p4  ;;  %p379_p1 = scmp.lt.s32.totalorder %s373_s18, %s559_s2 }
  0x19   : > { %v171_v8 = vperm.slane %v165_v7, 0  ;;  %v177_v9 = vperm.slane %v165_v7, 1  ;;  %v184_v10 = vperm.slane %v165_v7, 2  ;;  %v191_v11 = vperm.slane %v165_v7, 3  ;;  %p380_p2 = scmp.lt.s32.totalorder %s378_s25, %s374_s20 }
  0x1a   : > { %p377_p0 = pneg %p376_p13 }
  0x1b   : > { %p381_p3 = por %p380_p2, %p379_p1 }
  0x1d   : > { %p382_p5 = pnand %p381_p3, %p377_p0 }
  0x1e   : > { %354 = vset.pattern.permute.xlu0 %v440_v3  ;;  %356 = vset.pattern.permute.xlu1 %v441_v4 }
  0x1f   : > { %174 = vperm.xlu0 %354, %v164_v0   ;;  %188 = vperm.xlu1 %356, %v164_v0  }
  0x27   : > { %357 = vset.pattern.permute.xlu0 %v441_v4 }
  0x88   : > { %v169_v5 = vpop.permute.xlu0 %168  ;;  %v182_v6 = vpop.permute.xlu1 %181 }
  0x89   : > { %v172_v14 = vmul.f32 %v171_v8, %v169_v5  ;;  %v185_v16 = vmul.f32 %v184_v10, %v182_v6 }
  0x91   : > { %v175_v12 = vpop.permute.xlu0 %174  ;;  %v189_v13 = vpop.permute.xlu1 %188 }
  0x92   : > { %v178_v15 = vmul.f32 %v177_v9, %v175_v12  ;;  %v192_v18 = vmul.f32 %v191_v11, %v189_v13 }
  0x94   : > { %v179_v17 = vadd.f32 %v178_v15, %v172_v14 }
  0x96   : > { %v186_v19 = vadd.f32 %v185_v16, %v179_v17 }
  0x98   : > { %v193_v20 = vadd.f32 %v192_v18, %v186_v19 }
  0x9a   : > { %194 = vst [vmem:[%s156_s8] sm:$0xff] %v193_v20 }
  0x9b   : > { %385 = shalt.err (!%p382_p5)
}
  0x9c   : > { %294 = dma.vmem_to_hbm [thread:$0]  (%p497_p4), %s210_s15, 128, %s212_s16, %s196_s12  }
  0x9d PF: > { %p300_p6 = scmp.ge.s32.totalorder %s436_s14, 2  ;;  %s223_s28 = sand.u32 1, %s416_s9  }
  0x9e   : > { %s224_s29 = scalar_lea.sflag [#allocation3], %s223_s28 }
  0x9f   : > { %p297_p7 = pnand %p300_p6, %p504_p8 }
  0xa1   : > { %p298_p9 = pneg %p297_p7 }
  0xa3   : > { %411 = dma.done.wait (%p298_p9), %s224_s29, 128  }
  0xa4   : > { %413 = vsyncadd (%p298_p9), %s224_s29, 4294967168  ;;  %s15_s14 = sadd.s32 1, %s436_s14   ;;  %s562_s9 = smov %s420_s10 }
  0xa5   : > { %p12_p10 = scmp.ge.s32.totalorder %s15_s14, 4   ;;  %s563_s10 = smov %s424_s11 }
  0xa6   : > { %s564_s11 = smov %s510_s22  ;;  %s565_s12 = smov %s432_s13 }
  0xa7   : > { %s566_s13 = smov %s568_s17  ;;  %14 = sbr.rel (!%p12_p10) target bundleno = 4 (0x4), region = 63 }
  0xac   :  { %230 = vsyncpa [#allocation3], 1 }
  0xad   :  { %232 = vsyncpa [#allocation3 + $0x1], 1 }

</bundles_post_ra>
